<compile_context>
chip_gen: v7x
topology: tpu7x:2x2x1
jax: 0.10.0
libtpu: 0.0.40
codegen_flags: <defaults>
</compile_context>

<pallas_src>
import math
import numpy as np
import jax
import jax.numpy as jnp
from jax import lax
from jax.experimental import pallas as pl
from jax.experimental.pallas import tpu as pltpu

# ------------------------- configuration (small, consistent with module) ----
BATCH      = 2
N_HEADS    = 2
HEAD_SIZE  = 16
D          = N_HEADS * HEAD_SIZE      # 32
D_MODEL    = 32
LENGTH     = 8                        # klen == length == target_len
QLEN       = 8
NUM_BASIS  = 16                       # multiple of len(SIGMAS)
SIGMAS     = (0.01, 0.05)
RIDGE      = 1.0
INV_SQRT_2PI = 1.0 / math.sqrt(2.0 * math.pi)

BN  = BATCH * NUM_BASIS               # 32   (b', n) blocks
HBN = N_HEADS * BN                    # 64   (h, b', n) columns / rows
LB  = LENGTH * BATCH                  # 16   flattened k rows
BQ  = QLEN * BATCH                    # 16   flattened q rows

# slab_w (width D) row offsets: [Wk^T*scale ; Wv^T ; Wout^T ; GT3]
_WK_OFF, _WV_OFF, _WOUT_OFF, _GT_OFF = 0, D, 2 * D, 3 * D
_SLABW_ROWS = _GT_OFF + HBN                       # 160

# slab_p (width HBN) row offsets: [Wmu_big ; Wsig_big ; head_mask ; bmask ; basis]
_WMU_OFF, _WSIG_OFF, _HMASK_OFF = 0, HBN, 2 * HBN
_BMASK_OFF = 3 * HBN
_BASIS_OFF = 3 * HBN + BQ
_SLABP_ROWS = _BASIS_OFF + 8                      # 216


# ------------------------- host-side basis / G construction (glue) ----------
def make_basis():
    # torch.meshgrid(linspace(0,1,N//2), sigmas) with 'ij' indexing, flattened.
    mu_lin = np.linspace(0.0, 1.0, NUM_BASIS // len(SIGMAS))
    basis_mu = np.repeat(mu_lin, len(SIGMAS)).astype(np.float64)
    basis_sigma = np.tile(np.asarray(SIGMAS, np.float64), NUM_BASIS // len(SIGMAS))
    return basis_mu, basis_sigma


def compute_G(l, basis_mu, basis_sigma, padding=True):
    # Matches LongTermAttention.compute_G (linear spacing, padding=True).
    if l % 2:
        shift = 1.0 / float(l)
        positions = np.linspace(-0.5 + shift, 1.5 - shift, 2 * l - 1)
    else:
        shift = 1.0 / float(2 * l)
        positions = np.linspace(-0.5 + shift, 1.5 - shift, 2 * l)
    t = positions[:, None]                                        # (P, 1)
    phi = np.exp(-0.5 * ((t - basis_mu[None, :]) / basis_sigma[None, :]) ** 2)
    F = (INV_SQRT_2PI * phi / basis_sigma[None, :]).T             # (N, P)
    I = np.eye(NUM_BASIS)
    G = F.T @ np.linalg.inv(F @ F.T + RIDGE * I)                  # (P, N)
    if padding:
        if l % 2:
            G = G[(l - 1) // 2: -((l - 1) // 2), :]
        else:
            G = G[l // 2: -(l // 2), :]
    return G                                                      # (l, N)


# ------------------------- host-side operand packing -------------------------
def build_constants(G, Wk, Wv, Wout, w_mu, w_sigma, basis_mu, basis_sigma):
    assert D_MODEL == D, "slab packing assumes d_model == n_heads*head_size"
    G = np.asarray(G, np.float32)                                 # (LENGTH, N)
    Wk = np.asarray(Wk, np.float32)
    Wv = np.asarray(Wv, np.float32)
    Wout = np.asarray(Wout, np.float32)                           # (D_MODEL, D)
    w_mu = np.asarray(w_mu, np.float32).reshape(-1)
    w_sigma = np.asarray(w_sigma, np.float32).reshape(-1)
    basis_mu = np.asarray(basis_mu, np.float32)
    basis_sigma = np.asarray(basis_sigma, np.float32)
    scale = 1.0 / math.sqrt(HEAD_SIZE)

    # ---- width-D slab: Wk^T*scale, Wv^T, Wout^T, block-diag/head-replicated G^T
    GT2 = np.zeros((BN, LB), np.float32)          # rows (b, n), cols (t, b_in)=t*B+b_in
    for b in range(BATCH):
        GT2[b * NUM_BASIS:(b + 1) * NUM_BASIS, b::BATCH] = G.T
    GT3 = np.tile(GT2, (N_HEADS, 1))                              # (HBN, LB)
    GT3_pad = np.zeros((HBN, D), np.float32)
    GT3_pad[:, :LB] = GT3
    slab_w = np.concatenate([Wk.T * scale, Wv.T, Wout.T, GT3_pad], axis=0)
    assert slab_w.shape == (_SLABW_ROWS, D)

    # ---- width-HBN slab: block mu/sigma weights (with built-in broadcast back
    #      to all (h, b', n) columns), static head/batch masks, tiled basis rows.
    Wmu_big = np.zeros((HBN, HBN), np.float32)
    Wsig_big = np.zeros((HBN, HBN), np.float32)
    wmu_rep = np.tile(w_mu, BATCH)[:, None]                       # (BN, 1)
    wsig_rep = np.tile(w_sigma, BATCH)[:, None]
    for h in range(N_HEADS):
        sl = slice(h * BN, (h + 1) * BN)
        Wmu_big[sl, sl] = wmu_rep                                  # broadcast over cols
        Wsig_big[sl, sl] = wsig_rep

    # head mask: keys/values row (h, b', n) keeps only feature dims of head h
    row_h = (np.arange(HBN) // BN)[:, None]
    col_h = (np.arange(D) // HEAD_SIZE)[None, :]
    head_mask = np.zeros((HBN, HBN), np.float32)
    head_mask[:, :D] = (row_h == col_h).astype(np.float32)

    # batch mask: score/r row (q, b) keeps only columns (h, b'==b, n)
    row_b = (np.arange(BQ) % BATCH)[:, None]
    col_b = ((np.arange(HBN) // NUM_BASIS) % BATCH)[None, :]
    bmask = (row_b == col_b).astype(np.float32)                   # (BQ, HBN)

    basis_rows = np.zeros((8, HBN), np.float32)
    basis_rows[0] = np.tile(basis_mu, N_HEADS * BATCH)            # basis mu per column
    basis_rows[1] = np.tile(basis_sigma ** 2, N_HEADS * BATCH)    # basis sigma^2

    slab_p = np.concatenate([Wmu_big, Wsig_big, head_mask, bmask, basis_rows], axis=0)
    assert slab_p.shape == (_SLABP_ROWS, HBN)
    return jnp.asarray(slab_w), jnp.asarray(slab_p)


# ------------------------- Pallas kernel (hot path) --------------------------
def lta_kernel(k_ref, q_ref, ww_ref, wp_ref, out_ref):
    # k_ref : (LENGTH*BATCH, D)   rows ordered (t, b) = t*BATCH + b
    # q_ref : (QLEN*BATCH, D)     rows ordered (q, b) = q*BATCH + b
    # ww_ref: (_SLABW_ROWS, D)    [Wk^T*scale ; Wv^T ; Wout^T ; GT3(cols 0:LB)]
    # wp_ref: (_SLABP_ROWS, HBN)  [Wmu_big ; Wsig_big ; head_mask ; bmask ; basis]
    WkT_s = ww_ref[_WK_OFF:_WK_OFF + D, :]                         # (D, D)
    WvT   = ww_ref[_WV_OFF:_WV_OFF + D, :]                         # (D, D)
    WoutT = ww_ref[_WOUT_OFF:_WOUT_OFF + D, 0:D_MODEL]             # (D, D_MODEL)
    GT3   = ww_ref[_GT_OFF:_GT_OFF + HBN, 0:LB]                    # (HBN, LB)

    Wmu_big   = wp_ref[_WMU_OFF:_WMU_OFF + HBN, :]                 # (HBN, HBN)
    Wsig_big  = wp_ref[_WSIG_OFF:_WSIG_OFF + HBN, :]               # (HBN, HBN)
    head_mask = wp_ref[_HMASK_OFF:_HMASK_OFF + HBN, 0:D]           # (HBN, D)
    bmask     = wp_ref[_BMASK_OFF:_BMASK_OFF + BQ, :]              # (BQ, HBN)
    bmu_big   = wp_ref[_BASIS_OFF:_BASIS_OFF + 1, :]               # (1, HBN)
    bsig_sq   = wp_ref[_BASIS_OFF + 1:_BASIS_OFF + 2, :]           # (1, HBN)

    # 1) signatures B for both batches (head-replicated rows): one push
    B2 = jnp.dot(GT3, k_ref[...], preferred_element_type=jnp.float32)       # (HBN, D)

    # 2) keys / values for all (h, b', n) rows; head mask zeroes other heads' dims
    keys = jnp.dot(B2, WkT_s, preferred_element_type=jnp.float32) * head_mask
    vals = jnp.dot(B2, WvT,   preferred_element_type=jnp.float32) * head_mask

    # 3) all (batch, head) score blocks in one NT matmul; zero cross-batch columns
    scores = lax.dot_general(q_ref[...], keys, (((1,), (1,)), ((), ())),
                             preferred_element_type=jnp.float32)            # (BQ, HBN)
    scores = scores * bmask

    # 4) mu / sigma_sq heads; block weights also broadcast the scalar per (b,h,q)
    #    back to every (h, b', n) column, so no lane repeats are needed.
    mu_pre  = jnp.dot(scores, Wmu_big,  preferred_element_type=jnp.float32)  # (BQ, HBN)
    sig_pre = jnp.dot(scores, Wsig_big, preferred_element_type=jnp.float32)  # (BQ, HBN)
    mu = jax.nn.sigmoid(mu_pre)
    sig_sq = jnp.maximum(sig_pre, 0.0) + jnp.log1p(jnp.exp(-jnp.abs(sig_pre)))
    sig_sq = jnp.maximum(sig_sq, 1e-6)

    # 5) E_{N(mu, sigma_sq)}[psi]: Gaussian product, closed form
    inv_s = lax.rsqrt(bsig_sq + sig_sq)                                      # (BQ, HBN)
    z = (mu - bmu_big) * inv_s
    r = (INV_SQRT_2PI * inv_s) * jnp.exp(-0.5 * z * z) * bmask               # (BQ, HBN)

    # 6) per-head context folded straight into the output projection:
    #    VW[(h,b',n), m] = sum_{d in head h} values[b',n,d] * Wout[m,d]
    VW = jnp.dot(vals, WoutT, preferred_element_type=jnp.float32)            # (HBN, D_MODEL)
    out_ref[...] = jnp.dot(r, VW, preferred_element_type=jnp.float32)        # (BQ, D_MODEL)


# ------------------------- wrapper -------------------------------------------
@jax.jit
def long_term_attention(k, q, slab_w, slab_p):
    # k: (klen, B, D)  q: (qlen, B, D)  ->  out: (qlen, B, D_MODEL)
    k2 = k.reshape(LENGTH * BATCH, D)        # free row-major view
    q2 = q.reshape(QLEN * BATCH, D)
    vmem = pl.BlockSpec(memory_space=pltpu.MemorySpace.VMEM)
    out2 = pl.pallas_call(
        lta_kernel,
        out_shape=jax.ShapeDtypeStruct((QLEN * BATCH, D_MODEL), jnp.float32),
        in_specs=[vmem, vmem, vmem, vmem],
        out_specs=vmem,
    )(k2, q2, slab_w, slab_p)
    return out2.reshape(QLEN, BATCH, D_MODEL)


# ------------------------- pure-numpy reference (torch semantics) ------------
def reference_numpy(k, q, G, Wk, Wv, Wout, w_mu, w_sigma, basis_mu, basis_sigma):
    k = np.asarray(k, np.float64); q = np.asarray(q, np.float64)
    G = np.asarray(G, np.float64)
    Wk = np.asarray(Wk, np.float64); Wv = np.asarray(Wv, np.float64)
    Wout = np.asarray(Wout, np.float64)
    w_mu = np.asarray(w_mu, np.float64); w_sigma = np.asarray(w_sigma, np.float64)
    klen, batch, d = k.shape
    qlen = q.shape[0]

    x = np.transpose(k, (1, 2, 0))                           # (B, D, klen)
    B = np.einsum('bct,tn->bcn', x, G)                       # (B, D, N)
    B = np.transpose(B, (0, 2, 1))                           # (B, N, D)
    keys = B @ Wk.T
    values = B @ Wv.T
    query = np.transpose(q, (1, 0, 2))                       # (B, qlen, D)
    query = query.reshape(batch, qlen, N_HEADS, HEAD_SIZE).transpose(0, 2, 1, 3)
    keys = keys.reshape(batch, NUM_BASIS, N_HEADS, HEAD_SIZE).transpose(0, 2, 1, 3)
    values = values.reshape(batch, NUM_BASIS, N_HEADS, HEAD_SIZE).transpose(0, 2, 1, 3)

    scores = (query / math.sqrt(HEAD_SIZE)) @ np.swapaxes(keys, -1, -2)   # (B,H,q,N)
    mu = 1.0 / (1.0 + np.exp(-(scores @ w_mu.T)))                         # (B,H,q,1)
    sig_sq = np.logaddexp(scores @ w_sigma.T, 0.0)
    sig_sq = np.maximum(sig_sq, 1e-6)

    s = np.sqrt(basis_sigma ** 2 + sig_sq)                                # (B,H,q,N)
    r = INV_SQRT_2PI * np.exp(-0.5 * ((mu - basis_mu) / s) ** 2) / s      # (B,H,q,N)

    context = np.einsum('bhnd,bhqn->bhdq', values, r)                     # (B,H,dh,q)
    context = np.transpose(context, (3, 0, 1, 2)).reshape(qlen, batch, N_HEADS * HEAD_SIZE)
    return context @ Wout.T                                               # (qlen, B, d_model)


# ------------------------- main ----------------------------------------------
if __name__ == "__main__":
    basis_mu_np, basis_sigma_np = make_basis()
    G_np = compute_G(LENGTH, basis_mu_np, basis_sigma_np, padding=True)   # (klen, N)

    key = jax.random.PRNGKey(0)
    ks = jax.random.split(key, 8)
    Wk = jax.random.normal(ks[0], (D, D), jnp.float32) / math.sqrt(D)
    Wv = jax.random.normal(ks[1], (D, D), jnp.float32) / math.sqrt(D)
    Wout = jax.random.normal(ks[2], (D_MODEL, D), jnp.float32) / math.sqrt(D)
    w_mu = jax.random.normal(ks[3], (1, NUM_BASIS), jnp.float32) / math.sqrt(NUM_BASIS)
    w_sigma = jax.random.normal(ks[4], (1, NUM_BASIS), jnp.float32) / math.sqrt(NUM_BASIS)
    k_in = jax.random.normal(ks[5], (LENGTH, BATCH, D), jnp.float32)
    q_in = jax.random.normal(ks[6], (QLEN, BATCH, D), jnp.float32)

    # One-time host-side packing of all constant operands into two VMEM slabs.
    slab_w, slab_p = build_constants(G_np, Wk, Wv, Wout, w_mu, w_sigma,
                                     basis_mu_np, basis_sigma_np)

    # TODO(synk): the infinite-memory continuation path (B_past/samples/G_inf), the
    # CNN reg-mask branch, kl_regularizer, and attn_dropout are not exercised here
    # (mask=False, new_doc=True, eval), matching the module's first-call forward.

    out = long_term_attention(k_in, q_in, slab_w, slab_p)
    out = jax.block_until_ready(out)                                      # (qlen, B, D_MODEL)

    ref = reference_numpy(k_in, q_in, G_np, Wk, Wv, Wout, w_mu, w_sigma,
                          basis_mu_np, basis_sigma_np)
    np.testing.assert_allclose(np.asarray(out, np.float64), ref, rtol=2e-2, atol=2e-2)
    print("KERNEL_OK")
</pallas_src>

<mosaic_0001>
module attributes {stable_mosaic.version = 11 : i64} {
  func.func @lta_kernel(%arg0: memref<16x32xf32, #tpu.memory_space<vmem>>, %arg1: memref<16x32xf32, #tpu.memory_space<vmem>>, %arg2: memref<160x32xf32, #tpu.memory_space<vmem>>, %arg3: memref<216x64xf32, #tpu.memory_space<vmem>>, %arg4: memref<16x32xf32, #tpu.memory_space<vmem>>) attributes {dimension_semantics = [], scalar_prefetch = 0 : i64, scratch_operands = 0 : i64, tpu.core_type = #tpu.core_type<tc>} {
    %c0 = arith.constant 0 : index
    %c0_0 = arith.constant 0 : index
    %0 = vector.load %arg2[%c0, %c0_0] : memref<160x32xf32, #tpu.memory_space<vmem>>, vector<32x32xf32>
    %c32 = arith.constant 32 : index
    %c0_1 = arith.constant 0 : index
    %1 = vector.load %arg2[%c32, %c0_1] : memref<160x32xf32, #tpu.memory_space<vmem>>, vector<32x32xf32>
    %c64 = arith.constant 64 : index
    %c0_2 = arith.constant 0 : index
    %2 = vector.load %arg2[%c64, %c0_2] : memref<160x32xf32, #tpu.memory_space<vmem>>, vector<32x32xf32>
    %c96 = arith.constant 96 : index
    %c0_3 = arith.constant 0 : index
    %3 = vector.load %arg2[%c96, %c0_3] : memref<160x32xf32, #tpu.memory_space<vmem>>, vector<64x16xf32>
    %c0_4 = arith.constant 0 : index
    %c0_5 = arith.constant 0 : index
    %4 = vector.load %arg3[%c0_4, %c0_5] : memref<216x64xf32, #tpu.memory_space<vmem>>, vector<64x64xf32>
    %c64_6 = arith.constant 64 : index
    %c0_7 = arith.constant 0 : index
    %5 = vector.load %arg3[%c64_6, %c0_7] : memref<216x64xf32, #tpu.memory_space<vmem>>, vector<64x64xf32>
    %c128 = arith.constant 128 : index
    %c0_8 = arith.constant 0 : index
    %6 = vector.load %arg3[%c128, %c0_8] : memref<216x64xf32, #tpu.memory_space<vmem>>, vector<64x32xf32>
    %c192 = arith.constant 192 : index
    %c0_9 = arith.constant 0 : index
    %7 = vector.load %arg3[%c192, %c0_9] : memref<216x64xf32, #tpu.memory_space<vmem>>, vector<16x64xf32>
    %c208 = arith.constant 208 : index
    %c0_10 = arith.constant 0 : index
    %8 = vector.load %arg3[%c208, %c0_10] : memref<216x64xf32, #tpu.memory_space<vmem>>, vector<1x64xf32>
    %c209 = arith.constant 209 : index
    %c0_11 = arith.constant 0 : index
    %9 = vector.load %arg3[%c209, %c0_11] : memref<216x64xf32, #tpu.memory_space<vmem>>, vector<1x64xf32>
    %c0_12 = arith.constant 0 : index
    %c0_13 = arith.constant 0 : index
    %10 = vector.load %arg0[%c0_12, %c0_13] : memref<16x32xf32, #tpu.memory_space<vmem>>, vector<16x32xf32>
    %cst = arith.constant dense<0.000000e+00> : vector<64x32xf32>
    %11 = tpu.matmul %3, %10, %cst {dimension_numbers = #tpu.dot_dimension_numbers<[1], [0], [0], [1], [0, 0, 1, 1], [], []>} : vector<64x16xf32>, vector<16x32xf32>, vector<64x32xf32> -> vector<64x32xf32>
    %cst_14 = arith.constant dense<0.000000e+00> : vector<64x32xf32>
    %12 = tpu.matmul %11, %0, %cst_14 {dimension_numbers = #tpu.dot_dimension_numbers<[1], [0], [0], [1], [0, 0, 1, 1], [], []>} : vector<64x32xf32>, vector<32x32xf32>, vector<64x32xf32> -> vector<64x32xf32>
    %13 = arith.mulf %12, %6 : vector<64x32xf32>
    %cst_15 = arith.constant dense<0.000000e+00> : vector<64x32xf32>
    %14 = tpu.matmul %11, %1, %cst_15 {dimension_numbers = #tpu.dot_dimension_numbers<[1], [0], [0], [1], [0, 0, 1, 1], [], []>} : vector<64x32xf32>, vector<32x32xf32>, vector<64x32xf32> -> vector<64x32xf32>
    %15 = arith.mulf %14, %6 : vector<64x32xf32>
    %c0_16 = arith.constant 0 : index
    %c0_17 = arith.constant 0 : index
    %16 = vector.load %arg1[%c0_16, %c0_17] : memref<16x32xf32, #tpu.memory_space<vmem>>, vector<16x32xf32>
    %cst_18 = arith.constant dense<0.000000e+00> : vector<16x64xf32>
    %17 = tpu.matmul %16, %13, %cst_18 {dimension_numbers = #tpu.dot_dimension_numbers<[1], [1], [0], [0], [0, 0, 1, 0], [], []>} : vector<16x32xf32>, vector<64x32xf32>, vector<16x64xf32> -> vector<16x64xf32>
    %18 = arith.mulf %17, %7 : vector<16x64xf32>
    %cst_19 = arith.constant dense<0.000000e+00> : vector<16x64xf32>
    %19 = tpu.matmul %18, %4, %cst_19 {dimension_numbers = #tpu.dot_dimension_numbers<[1], [0], [0], [1], [0, 0, 1, 1], [], []>} : vector<16x64xf32>, vector<64x64xf32>, vector<16x64xf32> -> vector<16x64xf32>
    %cst_20 = arith.constant dense<0.000000e+00> : vector<16x64xf32>
    %20 = tpu.matmul %18, %5, %cst_20 {dimension_numbers = #tpu.dot_dimension_numbers<[1], [0], [0], [1], [0, 0, 1, 1], [], []>} : vector<16x64xf32>, vector<64x64xf32>, vector<16x64xf32> -> vector<16x64xf32>
    %21 = arith.negf %19 : vector<16x64xf32>
    %22 = math.exp %21 : vector<16x64xf32>
    %cst_21 = arith.constant 1.000000e+00 : f32
    %23 = vector.broadcast %cst_21 : f32 to vector<16x64xf32>
    %24 = arith.addf %23, %22 : vector<16x64xf32>
    %25 = arith.divf %23, %24 : vector<16x64xf32>
    %cst_22 = arith.constant 0.000000e+00 : f32
    %26 = vector.broadcast %cst_22 : f32 to vector<16x64xf32>
    %27 = arith.maximumf %20, %26 : vector<16x64xf32>
    %28 = math.absf %20 : vector<16x64xf32>
    %cst_23 = arith.constant 0.000000e+00 : f32
    %29 = vector.broadcast %cst_23 : f32 to vector<16x64xf32>
    %30 = arith.subf %29, %28 : vector<16x64xf32>
    %31 = math.exp %30 : vector<16x64xf32>
    %32 = math.log1p %31 : vector<16x64xf32>
    %33 = arith.addf %27, %32 : vector<16x64xf32>
    %cst_24 = arith.constant 9.99999997E-7 : f32
    %34 = vector.broadcast %cst_24 : f32 to vector<16x64xf32>
    %35 = arith.maximumf %33, %34 : vector<16x64xf32>
    %36 = vector.broadcast %9 : vector<1x64xf32> to vector<16x64xf32>
    %37 = arith.addf %36, %35 : vector<16x64xf32>
    %38 = math.rsqrt %37 : vector<16x64xf32>
    %39 = vector.broadcast %8 : vector<1x64xf32> to vector<16x64xf32>
    %40 = arith.subf %25, %39 : vector<16x64xf32>
    %41 = arith.mulf %40, %38 : vector<16x64xf32>
    %cst_25 = arith.constant 0.398942292 : f32
    %42 = vector.broadcast %cst_25 : f32 to vector<16x64xf32>
    %43 = arith.mulf %42, %38 : vector<16x64xf32>
    %cst_26 = arith.constant -5.000000e-01 : f32
    %44 = vector.broadcast %cst_26 : f32 to vector<16x64xf32>
    %45 = arith.mulf %44, %41 : vector<16x64xf32>
    %46 = arith.mulf %45, %41 : vector<16x64xf32>
    %47 = math.exp %46 : vector<16x64xf32>
    %48 = arith.mulf %43, %47 : vector<16x64xf32>
    %49 = arith.mulf %48, %7 : vector<16x64xf32>
    %cst_27 = arith.constant dense<0.000000e+00> : vector<64x32xf32>
    %50 = tpu.matmul %15, %2, %cst_27 {dimension_numbers = #tpu.dot_dimension_numbers<[1], [0], [0], [1], [0, 0, 1, 1], [], []>} : vector<64x32xf32>, vector<32x32xf32>, vector<64x32xf32> -> vector<64x32xf32>
    %cst_28 = arith.constant dense<0.000000e+00> : vector<16x32xf32>
    %51 = tpu.matmul %49, %50, %cst_28 {dimension_numbers = #tpu.dot_dimension_numbers<[1], [0], [0], [1], [0, 0, 1, 1], [], []>} : vector<16x64xf32>, vector<64x32xf32>, vector<16x32xf32> -> vector<16x32xf32>
    %c0_29 = arith.constant 0 : index
    %c0_30 = arith.constant 0 : index
    %52 = vector.load %arg4[%c0_29, %c0_30] : memref<16x32xf32, #tpu.memory_space<vmem>>, vector<16x32xf32>
    tpu.vector_store %arg4[%c0_29, %c0_30], %51 {strides = array<i32>} : memref<16x32xf32, #tpu.memory_space<vmem>>, vector<16x32xf32>,
    return
  }
}

</mosaic_0001>

<bundles_post_ra>
// kernel: long_term_attention.1
= control target key start
LH: loop header
LB: loop body
LE: loop exit
PB: predicated region body
PF: predicated region fallthrough
CT: control target
= control target key end

     0   :  { %vm68_vm0 = vcmask 130048   ;;  %s1726_s0 = inlined_call_operand.vmem [shape: f32[16,32], index: 0, kind: input, shape index: {}]   ;;  %s1727_s1 = inlined_call_operand.vmem [shape: f32[16,32], index: 1, kind: input, shape index: {}]   ;;  %s1728_s2 = inlined_call_operand.vmem [shape: f32[160,32], index: 2, kind: input, shape index: {}]   ;;  %s1729_s3 = inlined_call_operand.vmem [shape: f32[216,64], index: 3, kind: input, shape index: {}]   ;;  %s1730_s4 = inlined_call_operand.hbm [shape: f32[16,32], index: 4, kind: output, shape index: {}]  }
   0x1   :  { %v66_v0 = vld [vmem:[%s1726_s0] sm:$0xff]  ;;  %v67_v1 = vld [vmem:[%s1726_s0 + $0x8] sm:$0xff]  ;;  %v32_v5 = vld [vmem:[%s1728_s2 + $0x70] sm:$0xff] }
   0x2   :  { %v30_v2 = vld [vmem:[%s1728_s2 + $0x60] sm:$0xff]  ;;  %v1307_v3 = vpack.c.bf16 %v67_v1, %v66_v0  ;;  %v31_v4 = vld [vmem:[%s1728_s2 + $0x68] sm:$0xff]  ;;  %v20_v11 = vld [vmem:[%s1728_s2 + $0x10] sm:$0xff] }
   0x3   :  { %1159 = vmatprep.mubr.msk.f32.mxu0 %vm68_vm0, %v30_v2  ;;  %v18_v6 = vld [vmem:[%s1728_s2] sm:$0xff]  ;;  %v19_v7 = vld [vmem:[%s1728_s2 + $0x8] sm:$0xff]  ;;  %v21_v13 = vld [vmem:[%s1728_s2 + $0x18] sm:$0xff] }
   0x4   :  { %1308 = vmatprep.subr.bf16.mxu0 %v1307_v3  ;;  %v1311_v8 = vpack.c.bf16 %v19_v7, %v18_v6  ;;  %v22_v9 = vld [vmem:[%s1728_s2 + $0x20] sm:$0xff]  ;;  %v23_v10 = vld [vmem:[%s1728_s2 + $0x28] sm:$0xff]  ;;  %v24_v14 = vld [vmem:[%s1728_s2 + $0x30] sm:$0xff]  ;;  %v1315_v16 = vpack.c.bf16 %v21_v13, %v20_v11 }
   0x5   :  { %1310 = vmatpush3.bf16.msra.mxu0 %v1307_v3  ;;  %v1319_v12 = vpack.c.bf16 %v23_v10, %v22_v9  ;;  %v25_v15 = vld [vmem:[%s1728_s2 + $0x38] sm:$0xff] }
   0x6   :  { %1312 = vmatprep.subr.bf16.mxu1 %v1311_v8  ;;  %v1323_v17 = vpack.c.bf16 %v25_v15, %v24_v14 }
   0x7   :  { %9 = vsyncpa [#allocation3], 0  ;;  %1320 = vmatprep.subr.bf16.mxu0 %v1319_v12  ;;  %v33_v18 = vld [vmem:[%s1728_s2 + $0x78] sm:$0xff]  ;;  %1314 = vmatpush3.bf16.msra.mxu1 %v1311_v8  ;;  %v34_v19 = vld [vmem:[%s1728_s2 + $0x80] sm:$0xff]  ;;  %vm198_vm1 = vcmask 261120   ;;  %vm558_vm3 = vcmask 523264  }
   0x8   :  { %1160 = vmatmul.mubr.msk.f32.vlgmr.msra.gmra.mrb[0].mxu0 %vm68_vm0, %v31_v4  ;;  %1316 = vmatprep.subr.bf16.mxu1 %v1315_v16  ;;  %v35_v20 = vld [vmem:[%s1728_s2 + $0x88] sm:$0xff]  ;;  %v36_v21 = vld [vmem:[%s1728_s2 + $0x90] sm:$0xff]  ;;  %v37_v22 = vld [vmem:[%s1728_s2 + $0x98] sm:$0xff] }
   0x9   :  { %1162 = vmatprep.mubr.msk.f32.mxu0 %vm68_vm0, %v32_v5  ;;  %1322 = vmatpush3.bf16.msra.mxu0 %v1319_v12  ;;  %v449_v31 = vld [vmem:[%s1727_s1] sm:$0xff]  ;;  %v39_v33 = vld [vmem:[%s1729_s3 + $0x8] sm:$0xff]  ;;  %v40_v34 = vld [vmem:[%s1729_s3 + $0x10] sm:$0xff] }
   0xa   :  { %1324 = vmatprep.subr.bf16.mxu0 %v1323_v17  ;;  %v38_v32 = vld [vmem:[%s1729_s3] sm:$0xff]  ;;  %v41_v36 = vld [vmem:[%s1729_s3 + $0x18] sm:$0xff]  ;;  %v43_v39 = vld [vmem:[%s1729_s3 + $0x28] sm:$0xff] }
   0xb   :  { %1318 = vmatpush3.bf16.msra.mxu1 %v1315_v16  ;;  %v1351_v35 = vpack.c.bf16 %v39_v33, %v38_v32  ;;  %v1355_v37 = vpack.c.bf16 %v41_v36, %v40_v34  ;;  %v42_v38 = vld [vmem:[%s1729_s3 + $0x20] sm:$0xff]  ;;  %v55_v41 = vld [vmem:[%s1729_s3 + $0x88] sm:$0xff]  ;;  %v57_v49 = vld [vmem:[%s1729_s3 + $0x98] sm:$0xff] }
   0xc   :  { %1163 = vmatmul.mubr.msk.f32.gmra.mrb[2].mxu0 %vm68_vm0, %v33_v18  ;;  %v1359_v40 = vpack.c.bf16 %v43_v39, %v42_v38  ;;  %v54_v42 = vld [vmem:[%s1729_s3 + $0x80] sm:$0xff]  ;;  %v56_v50 = vld [vmem:[%s1729_s3 + $0x90] sm:$0xff]  ;;  %vm1600_vm2 = vmpackc.low %vm198_vm1, %vm198_vm1 }
   0xd   :  { %1165 = vmatprep.mubr.msk.f32.mxu0 %vm68_vm0, %v34_v19  ;;  %1326 = vmatpush3.bf16.msra.mxu0 %v1323_v17  ;;  %v59_v59 = vld [vmem:[%s1729_s3 + $0xa8] sm:$0xff]  ;;  %v58_v60 = vld [vmem:[%s1729_s3 + $0xa0] sm:$0xff]  ;;  %v61_v4 = vld [vmem:[%s1729_s3 + $0xb8] sm:$0xff] }
   0xe   :  { %1352 = vmatprep.subr.bf16.mxu0 %v1351_v35  ;;  %v60_v5 = vld [vmem:[%s1729_s3 + $0xb0] sm:$0xff]  ;;  %v26_v14 = vld [vmem:[%s1728_s2 + $0x40] sm:$0xff]  ;;  %v27_v15 = vld [vmem:[%s1728_s2 + $0x48] sm:$0xff] }
   0xf   :  { %v1383_v16 = vpack.c.bf16 %v27_v15, %v26_v14  ;;  %v28_v17 = vld [vmem:[%s1728_s2 + $0x50] sm:$0xff]  ;;  %v29_v18 = vld [vmem:[%s1728_s2 + $0x58] sm:$0xff]  ;;  %v450_v19 = vld [vmem:[%s1727_s1 + $0x8] sm:$0xff] }
  0x10   :  { %1166 = vmatmul.mubr.msk.f32.gmra.mrb[4].mxu0 %vm68_vm0, %v35_v20  ;;  %v1387_v20 = vpack.c.bf16 %v29_v18, %v28_v17  ;;  %v46_v32 = vld [vmem:[%s1729_s3 + $0x40] sm:$0xff]  ;;  %v47_v33 = vld [vmem:[%s1729_s3 + $0x48] sm:$0xff]  ;;  %v48_v38 = vld [vmem:[%s1729_s3 + $0x50] sm:$0xff] }
  0x11   :  { %1168 = vmatprep.mubr.msk.f32.mxu0 %vm68_vm0, %v36_v21  ;;  %v1367_v34 = vpack.c.bf16 %v47_v33, %v46_v32  ;;  %v1676_v36 = vld [vmem:[%s1729_s3 + $0xc8] sm:$0xff]  ;;  %v49_v39 = vld [vmem:[%s1729_s3 + $0x58] sm:$0xff] }
  0x14   :  { %1169 = vmatmul.mubr.msk.f32.gmra.mrb[6].mxu0 %vm68_vm0, %v37_v22 }
  0xdb   :  { %v1161_v23 = vpop.f32.mrb[0].mxu0 }
  0xdc   :  { %v159_v24 = vpop.f32.mrb[1].mxu0 }
  0xdd   :  { %1179 = vmatprep.mubr.msk.f32.mxu1 %vm198_vm1, %v159_v24  ;;  %1199 = vmatprep.mubr.msk.f32.mxu0 %vm198_vm1, %v159_v24 }
  0xde   :  { %1180 = vmatmul.mubr.msk.f32.vlgmr.msra.gmra.mrb[0].mxu1 %vm198_vm1, %v1161_v23  ;;  %1200 = vmatmul.mubr.msk.f32.vlgmr.msra.gmra.mrb[8].mxu0 %vm198_vm1, %v1161_v23 }
  0xdf   :  { %v1164_v25 = vpop.f32.mrb[2].mxu0  ;;  %1354 = vmatpush3.bf16.msra.mxu0 %v1351_v35  ;;  %v1671_v35 = vld [vmem:[%s1729_s3 + $0xc0] sm:$0xff] }
  0xe0   :  { %v169_v26 = vpop.f32.mrb[3].mxu0  ;;  %1356 = vmatprep.subr.bf16.mxu0 %v1355_v37 }
  0xe1   :  { %1182 = vmatprep.mubr.msk.f32.mxu1 %vm198_vm1, %v169_v26  ;;  %1202 = vmatprep.mubr.msk.f32.mxu0 %vm198_vm1, %v169_v26 }
  0xe2   :  { %1183 = vmatmul.mubr.msk.f32.gmra.mrb[2].mxu1 %vm198_vm1, %v1164_v25  ;;  %1203 = vmatmul.mubr.msk.f32.gmra.mrb[10].mxu0 %vm198_vm1, %v1164_v25 }
  0xe3   :  { %v1167_v27 = vpop.f32.mrb[4].mxu0  ;;  %1358 = vmatpush3.bf16.msra.mxu0 %v1355_v37 }
  0xe4   :  { %v179_v28 = vpop.f32.mrb[5].mxu0  ;;  %1360 = vmatprep.subr.bf16.mxu0 %v1359_v40 }
  0xe5   :  { %1185 = vmatprep.mubr.msk.f32.mxu1 %vm198_vm1, %v179_v28  ;;  %1205 = vmatprep.mubr.msk.f32.mxu0 %vm198_vm1, %v179_v28 }
  0xe6   :  { %1186 = vmatmul.mubr.msk.f32.gmra.mrb[4].mxu1 %vm198_vm1, %v1167_v27  ;;  %1206 = vmatmul.mubr.msk.f32.gmra.mrb[12].mxu0 %vm198_vm1, %v1167_v27 }
  0xe7   :  { %v1170_v29 = vpop.f32.mrb[6].mxu0  ;;  %1362 = vmatpush3.bf16.msra.mxu0 %v1359_v40 }
  0xe8   :  { %v189_v30 = vpop.f32.mrb[7].mxu0 }
  0xe9   :  { %1188 = vmatprep.mubr.msk.f32.mxu1 %vm198_vm1, %v189_v30  ;;  %1208 = vmatprep.mubr.msk.f32.mxu0 %vm198_vm1, %v189_v30  ;;  %v45_v30 = vld [vmem:[%s1729_s3 + $0x38] sm:$0xff] }
  0xea   :  { %1189 = vmatmul.mubr.msk.f32.gmra.mrb[6].mxu1 %vm198_vm1, %v1170_v29  ;;  %1209 = vmatmul.mubr.msk.f32.gmra.mrb[14].mxu0 %vm198_vm1, %v1170_v29  ;;  %v44_v29 = vld [vmem:[%s1729_s3 + $0x30] sm:$0xff] }
  0xeb   :  { %1227 = vmatprep.mubr.msk.f32.mxu1 %vm198_vm1, %v449_v31  ;;  %v1363_v31 = vpack.c.bf16 %v45_v30, %v44_v29 }
  0xed   :  { %1364 = vmatprep.subr.bf16.mxu0 %v1363_v31 }
  0xee   :  { %1366 = vmatpush3.bf16.msra.mxu0 %v1363_v31 }
  0xef   :  { %1368 = vmatprep.subr.bf16.mxu0 %v1367_v34 }
 0x1b1   :  { %v1181_v43 = vpop.f32.mrb[0].mxu1  ;;  %v1201_v44 = vpop.f32.mrb[8].mxu0 }
 0x1b2   :  { %v329_v45 = vmul.f32 %v1181_v43, %v55_v41  ;;  %v289_v46 = vpop.f32.mrb[1].mxu1  ;;  %v402_v47 = vpop.f32.mrb[9].mxu0  ;;  %v442_v22 = vmul.f32 %v1201_v44, %v55_v41  ;;  %v1371_v43 = vpack.c.bf16 %v49_v39, %v48_v38  ;;  %v50_v44 = vld [vmem:[%s1729_s3 + $0x60] sm:$0xff] }
 0x1b3   :  { %v328_v48 = vmul.f32 %v289_v46, %v54_v42  ;;  %v441_v21 = vmul.f32 %v402_v47, %v54_v42 }
 0x1b5   :  { %v1327_v52 = vpack.c.bf16 %v329_v45, %v328_v48  ;;  %v1184_v53 = vpop.f32.mrb[2].mxu1  ;;  %v1204_v54 = vpop.f32.mrb[10].mxu0  ;;  %v51_v45 = vld [vmem:[%s1729_s3 + $0x68] sm:$0xff]  ;;  %v52_v48 = vld [vmem:[%s1729_s3 + $0x70] sm:$0xff] }
 0x1b6   :  { %v331_v55 = vmul.f32 %v1184_v53, %v57_v49  ;;  %v299_v56 = vpop.f32.mrb[3].mxu1  ;;  %v412_v57 = vpop.f32.mrb[11].mxu0  ;;  %v444_v24 = vmul.f32 %v1204_v54, %v57_v49  ;;  %v1375_v46 = vpack.c.bf16 %v51_v45, %v50_v44  ;;  %v53_v49 = vld [vmem:[%s1729_s3 + $0x78] sm:$0xff]  ;;  %v1058_v44 = vld [vmem:[%s1729_s3 + $0xd0] ss:$0 sm:$0xff] }
 0x1b7   :  { %v330_v58 = vmul.f32 %v299_v56, %v56_v50  ;;  %1329 = vmatprep.subr.msk.bf16.mxu1 %vm1600_vm2, %v1327_v52  ;;  %v443_v23 = vmul.f32 %v412_v57, %v56_v50 }
 0x1b8   :  { %1332 = vmatpush3.bf16.xpose.msk.msra.mxu1 %vm1600_vm2, %v1327_v52  ;;  %v1379_v52 = vpack.c.bf16 %v53_v49, %v52_v48 }
 0x1b9   :  { %v1333_v61 = vpack.c.bf16 %v331_v55, %v330_v58  ;;  %v1187_v62 = vpop.f32.mrb[4].mxu1  ;;  %v1207_v63 = vpop.f32.mrb[12].mxu0 }
 0x1ba   :  { %v333_v0 = vmul.f32 %v1187_v62, %v59_v59  ;;  %v309_v1 = vpop.f32.mrb[5].mxu1  ;;  %v422_v2 = vpop.f32.mrb[13].mxu0  ;;  %v446_v26 = vmul.f32 %v1207_v63, %v59_v59 }
 0x1bb   :  { %1335 = vmatprep.subr.msk.bf16.mxu1 %vm1600_vm2, %v1333_v61  ;;  %v332_v3 = vmul.f32 %v309_v1, %v58_v60  ;;  %v445_v25 = vmul.f32 %v422_v2, %v58_v60 }
 0x1bd   :  { %v1339_v6 = vpack.c.bf16 %v333_v0, %v332_v3  ;;  %v1190_v7 = vpop.f32.mrb[6].mxu1  ;;  %v1210_v8 = vpop.f32.mrb[14].mxu0 }
 0x1be   :  { %v335_v9 = vmul.f32 %v1190_v7, %v61_v4  ;;  %v319_v10 = vpop.f32.mrb[7].mxu1  ;;  %v432_v11 = vpop.f32.mrb[15].mxu0  ;;  %v448_v28 = vmul.f32 %v1210_v8, %v61_v4 }
 0x1bf   :  { %v334_v12 = vmul.f32 %v319_v10, %v60_v5  ;;  %v447_v27 = vmul.f32 %v432_v11, %v60_v5 }
 0x1c0   :  { %1338 = vmatpush3.bf16.xpose.msk.msra.mxu1 %vm1600_vm2, %v1333_v61 }
 0x1c1   :  { %1341 = vmatprep.subr.msk.bf16.mxu1 %vm1600_vm2, %v1339_v6  ;;  %v1345_v13 = vpack.c.bf16 %v335_v9, %v334_v12 }
 0x1c8   :  { %1344 = vmatpush3.bf16.xpose.msk.msra.mxu1 %vm1600_vm2, %v1339_v6 }
 0x1c9   :  { %1347 = vmatprep.subr.msk.bf16.mxu1 %vm1600_vm2, %v1345_v13 }
 0x1d0   :  { %1350 = vmatpush3.bf16.xpose.msk.msra.mxu1 %vm1600_vm2, %v1345_v13 }
 0x1d1   :  { %1384 = vmatprep.subr.bf16.mxu1 %v1383_v16 }
 0x1d7   :  { %1228 = vmatmul.mubr.msk.f32.vlgmr.msra.gmra.mrb[8].mxu1 %vm198_vm1, %v450_v19 }
 0x1d8   :  { %1386 = vmatpush3.bf16.msra.mxu1 %v1383_v16  ;;  %1276 = vmatprep.mubr.msk.f32.mxu1 %vm198_vm1, %v441_v21 }
 0x1d9   :  { %1388 = vmatprep.subr.bf16.mxu1 %v1387_v20 }
 0x1dc   :  { %1390 = vmatpush3.bf16.msra.mxu1 %v1387_v20 }
 0x1df   :  { %1277 = vmatmul.mubr.msk.f32.vlgmr.msra.gmra.mrb[10].mxu1 %vm198_vm1, %v442_v22 }
 0x1e0   :  { %1279 = vmatprep.mubr.msk.f32.mxu1 %vm198_vm1, %v443_v23 }
 0x1e3   :  { %1280 = vmatmul.mubr.msk.f32.gmra.mrb[12].mxu1 %vm198_vm1, %v444_v24 }
 0x1e4   :  { %1282 = vmatprep.mubr.msk.f32.mxu1 %vm198_vm1, %v445_v25 }
 0x1e7   :  { %1283 = vmatmul.mubr.msk.f32.gmra.mrb[14].mxu1 %vm198_vm1, %v446_v26 }
 0x1e8   :  { %1285 = vmatprep.mubr.msk.f32.mxu1 %vm198_vm1, %v447_v27 }
 0x1eb   :  { %1286 = vmatmul.mubr.msk.f32.gmra.mrb[16].mxu1 %vm198_vm1, %v448_v28 }
 0x2aa   :  { %v1229_v37 = vpop.f32.mrb[8].mxu1 }
 0x2ab   :  { %v547_v40 = vpop.f32.mrb[9].mxu1  ;;  %v557_v42 = vmul.f32 %v1229_v37, %v1676_v36  ;;  %v1057_v37 = vld [vmem:[%s1729_s3 + $0xd1] ss:$0 sm:$0xff]  ;;  %s1458_s3 = smov [#allocation2]  }
 0x2ac   :  { %v556_v41 = vmul.f32 %v547_v40, %v1671_v35  ;;  %s1006_s9 = sshll.u32 %s1458_s3, 4  ;;  %s1007_s9 = int_to_ptr.vmem [resolvable:$true] %s1006_s9 }
 0x2ad   :  { %s1434_s1 = scalar_lea.vmem %s1007_s9, 256  ;;  %p1439_p1 = scmp.lt.s32.totalorder %s1007_s9, %s1007_s9 }
 0x2ae   :  { %1246 = vmatprep.mubr.msk.f32.mxu0 %vm558_vm3, %v556_v41  ;;  %p1435_p0 = scmp.ne.s32.totalorder %s1007_s9, %s1434_s1  ;;  %p1440_p2 = scmp.lt.s32.totalorder %s1434_s1, %s1434_s1 }
 0x2af   :  { %1247 = vmatmul.mubr.msk.f32.vlgmr.msra.gmra.mrb[16].mxu0 %vm558_vm3, %v557_v42 }
 0x2b0   :  { %1370 = vmatpush3.bf16.msra.mxu0 %v1367_v34  ;;  %1265 = vmatprep.mubr.msk.f32.mxu0 %vm558_vm3, %v556_v41  ;;  %p1441_p3 = por %p1440_p2, %p1439_p1 }
 0x2b1   :  { %1372 = vmatprep.subr.bf16.mxu0 %v1371_v43 }
 0x2b2   :  { %v1278_v47 = vpop.f32.mrb[10].mxu1  ;;  %p1442_p4 = pnand %p1441_p3, %p1435_p0 }
 0x2b3   :  { %v879_v50 = vpop.f32.mrb[11].mxu1 }
 0x2b4   :  { %1374 = vmatpush3.bf16.msra.mxu0 %v1371_v43  ;;  %v1391_v51 = vpack.c.bf16 %v1278_v47, %v879_v50 }
 0x2b5   :  { %1376 = vmatprep.subr.bf16.mxu0 %v1375_v46 }
 0x2b6   :  { %v1281_v53 = vpop.f32.mrb[12].mxu1  ;;  %1392 = vmatprep.subr.bf16.mxu1 %v1391_v51 }
 0x2b7   :  { %v889_v54 = vpop.f32.mrb[13].mxu1  ;;  %1394 = vmatpush3.bf16.msra.mxu1 %v1391_v51 }
 0x2b8   :  { %1378 = vmatpush3.bf16.msra.mxu0 %v1375_v46  ;;  %v1395_v55 = vpack.c.bf16 %v1281_v53, %v889_v54 }
 0x2b9   :  { %1380 = vmatprep.subr.bf16.mxu0 %v1379_v52 }
 0x2ba   :  { %v1284_v56 = vpop.f32.mrb[14].mxu1  ;;  %1396 = vmatprep.subr.bf16.mxu1 %v1395_v55 }
 0x2bb   :  { %v899_v57 = vpop.f32.mrb[15].mxu1  ;;  %1398 = vmatpush3.bf16.msra.mxu1 %v1395_v55 }
 0x2bc   :  { %1382 = vmatpush3.bf16.msra.mxu0 %v1379_v52  ;;  %v1399_v58 = vpack.c.bf16 %v1284_v56, %v899_v57 }
 0x2be   :  { %v1287_v59 = vpop.f32.mrb[16].mxu1  ;;  %1400 = vmatprep.subr.bf16.mxu1 %v1399_v58 }
 0x2bf   :  { %1266 = vmatmul.mubr.msk.f32.vlgmr.msra.gmra.mrb[18].mxu0 %vm558_vm3, %v557_v42  ;;  %v909_v60 = vpop.f32.mrb[17].mxu1  ;;  %1402 = vmatpush3.bf16.msra.mxu1 %v1399_v58 }
 0x2c0   :  { %v1403_v61 = vpack.c.bf16 %v1287_v59, %v909_v60 }
 0x2c2   :  { %1404 = vmatprep.subr.bf16.mxu1 %v1403_v61 }
 0x2c3   :  { %1406 = vmatpush3.bf16.msra.mxu1 %v1403_v61 }
 0x382   :  { %v1248_v62 = vpop.f32.mrb[16].mxu0 }
 0x383   :  { %v631_v63 = vpop.f32.mrb[17].mxu0  ;;  %v1056_v8 = vmul.f32 -1.442695, %v1248_v62 }
 0x384   :  { %v1055_v9 = vmul.f32 -1.442695, %v631_v63 }
 0x392   :  { %v1267_v0 = vpop.f32.mrb[18].mxu0 }
 0x393   :  { %v730_v1 = vand.u32 2147483647, %v1267_v0  ;;  %v706_v2 = vpop.f32.mrb[19].mxu0  ;;  %v728_v27 = vmax.f32 %v1267_v0, 0.0 }
 0x394   :  { %v729_v3 = vand.u32 2147483647, %v706_v2  ;;  %v727_v32 = vmax.f32 %v706_v2, 0.0 }
 0x395   :  { %v732_v4 = vsub.f32 0.0, %v730_v1 }
 0x396   :  { %v731_v5 = vsub.f32 0.0, %v729_v3 }
 0x397   :  { %v735_v6 = vmul.f32 1.442695, %v732_v4 }
 0x398   :  { %v733_v7 = vmul.f32 1.442695, %v731_v5 }
 0x399   :  { %1410 = vpow2.f32 %v735_v6 }
 0x39a   :  { %1412 = vpow2.f32 %v733_v7 }
 0x39b   :  { %1414 = vpow2.f32 %v1056_v8 }
 0x39c   :  { %1416 = vpow2.f32 %v1055_v9 }
 0x3a3   :  { %v1411_v10 = vpop.eup %1410 }
 0x3a4   :  { %v1413_v11 = vpop.eup %1412  ;;  %v746_v12 = vadd.f32 1.0, %v1411_v10  ;;  %v749_v14 = vmul.f32 -0.5, %v1411_v10  ;;  %v752_v18 = vand.u32 2147483647, %v1411_v10 }
 0x3a5   :  { %v737_v13 = vadd.f32 1.0, %v1413_v11  ;;  %v740_v15 = vmul.f32 -0.5, %v1413_v11  ;;  %v1415_v17 = vpop.eup %1414  ;;  %v743_v21 = vand.u32 2147483647, %v1413_v11 }
 0x3a6   :  { %1418 = vlog2.f32 %v746_v12  ;;  %v750_v16 = vadd.f32 1.0, %v749_v14  ;;  %v1417_v20 = vpop.eup %1416  ;;  %v722_v24 = vadd.f32 1.0, %v1415_v17  ;;  %vm753_vm4 = vcmp.lt.f32.partialorder %v752_v18, 0.0004427343 }
 0x3a7   :  { %1420 = vlog2.f32 %v737_v13  ;;  %v741_v19 = vadd.f32 1.0, %v740_v15  ;;  %v721_v30 = vadd.f32 1.0, %v1417_v20  ;;  %vm744_vm5 = vcmp.lt.f32.partialorder %v743_v21, 0.0004427343 }
 0x3a8   :  { %v751_v26 = vmul.f32 %v1411_v10, %v750_v16  ;;  %1422 = vrcp.f32 %v722_v24 }
 0x3a9   :  { %v742_v29 = vmul.f32 %v1413_v11, %v741_v19  ;;  %1424 = vrcp.f32 %v721_v30 }
 0x3b0   :  { %v1419_v22 = vpop.eup %1418 }
 0x3b1   :  { %v1421_v23 = vpop.eup %1420  ;;  %v748_v25 = vmul.f32 0.6931472, %v1419_v22 }
 0x3b2   :  { %v739_v28 = vmul.f32 0.6931472, %v1421_v23  ;;  %v1423_v43 = vpop.eup %1422 }
 0x3b3   :  { %v754_v31 = vsel %vm753_vm4, %v751_v26, %v748_v25  ;;  %v1425_v45 = vpop.eup %1424  ;;  %v772_v46 = vsub.f32 %v1423_v43, %v1058_v44 }
 0x3b4   :  { %v756_v33 = vadd.f32 %v754_v31, %v728_v27  ;;  %v745_v34 = vsel %vm744_vm5, %v742_v29, %v739_v28  ;;  %v771_v48 = vsub.f32 %v1425_v45, %v1058_v44 }
 0x3b5   :  { %v755_v38 = vadd.f32 %v745_v34, %v727_v32 }
 0x3b6   :  { %v758_v39 = vmax.f32 %v756_v33, 1e-06 }
 0x3b7   :  { %v757_v40 = vmax.f32 %v755_v38, 1e-06 }
 0x3b8   :  { %v764_v41 = vadd.f32 %v1057_v37, %v758_v39 }
 0x3b9   :  { %v763_v42 = vadd.f32 %v1057_v37, %v757_v40 }
 0x3ba   :  { %1426 = vrsqrt.f32 %v764_v41 }
 0x3bb   :  { %1428 = vrsqrt.f32 %v763_v42 }
 0x3c4   :  { %v1427_v47 = vpop.eup %1426 }
 0x3c5   :  { %v1429_v49 = vpop.eup %1428  ;;  %v774_v50 = vmul.f32 %v1427_v47, %v772_v46  ;;  %v776_v58 = vmul.f32 0.3989423, %v1427_v47 }
 0x3c6   :  { %v773_v51 = vmul.f32 %v1429_v49, %v771_v48  ;;  %v775_v60 = vmul.f32 0.3989423, %v1429_v49 }
 0x3c7   :  { %v778_v52 = vmul.f32 -0.5, %v774_v50 }
 0x3c8   :  { %v777_v53 = vmul.f32 -0.5, %v773_v51 }
 0x3c9   :  { %v780_v54 = vmul.f32 %v778_v52, %v774_v50 }
 0x3ca   :  { %v779_v55 = vmul.f32 %v777_v53, %v773_v51 }
 0x3cb   :  { %v783_v56 = vmul.f32 1.442695, %v780_v54 }
 0x3cc   :  { %v781_v57 = vmul.f32 1.442695, %v779_v55 }
 0x3cd   :  { %1430 = vpow2.f32 %v783_v56 }
 0x3ce   :  { %1432 = vpow2.f32 %v781_v57 }
 0x3d7   :  { %v1431_v59 = vpop.eup %1430 }
 0x3d8   :  { %v1433_v61 = vpop.eup %1432  ;;  %v786_v62 = vmul.f32 %v1431_v59, %v776_v58 }
 0x3d9   :  { %v785_v63 = vmul.f32 %v1433_v61, %v775_v60 }
 0x3da   :  { %v788_v1 = vmul.f32 %v786_v62, %v1676_v36 }
 0x3db   :  { %v787_v0 = vmul.f32 %v785_v63, %v1671_v35 }
 0x3dd   :  { %1304 = vmatprep.mubr.msk.f32.mxu1 %vm558_vm3, %v787_v0 }
 0x3de   :  { %1305 = vmatmul.mubr.msk.f32.vlgmr.msra.gmra.mrb[18].mxu1 %vm558_vm3, %v788_v1 }
 0x4b1   :  { %v1306_v2 = vpop.f32.mrb[18].mxu1 }
 0x4b2   :  { %1000 = vst.msk [vmem:[#allocation2 + $0x8] sm:$0xff] %vm198_vm1, %v1306_v2  ;;  %v990_v3 = vpop.f32.mrb[19].mxu1 }
 0x4b3   :  { %999 = vst.msk [vmem:[#allocation2] sm:$0xff] %vm198_vm1, %v990_v3 }
 0x4b4   :  { %1445 = shalt.err (!%p1442_p4)
}
 0x4b5   :  { %s1446_s11 = scalar_lea.hbm %s1730_s4, 256 }
 0x4b6   :  { %p1447_p5 = scmp.ne.s32.totalorder %s1730_s4, %s1446_s11  ;;  %p1450_p6 = scmp.lt.u32.totalorder %s1446_s11, %s1730_s4 }
 0x4b8   :  { %p1452_p7 = pnand %p1450_p6, %p1447_p5 }
 0x4ba   :  { %1455 = shalt.err (!%p1452_p7)
}
 0x4bb   :  { %s1459_s16 = smov 128   ;;  %s1460_s17 = smov 8  }
 0x4bc   :  { %1012 = dma.vmem_to_hbm [thread:$0]  %s1007_s9, 256, %s1730_s4, [#allocation3], %s1459_s16, %s1459_s16, %s1460_s17  }
 0x4bd   :  { %1456 = dma.done.wait [#allocation3], 256  }
 0x4be   :  { %1457 = vsyncadd [#allocation3], 4294967040 }
 0x4bf   :  { %1016 = vsyncpa [#allocation3], 1 }

</bundles_post_ra>
